<compile_context>
chip_gen: v7x
topology: tpu7x:2x2x1
jax: 0.10.0
libtpu: 0.0.40
codegen_flags: <defaults>
</compile_context>

<pallas_src>
import math

import jax
import jax.numpy as jnp
from jax.experimental import pallas as pl
from jax.experimental.pallas import tpu as pltpu

NEG_SLOPE = 0.2           # LeakyReLU / FusedLeakyReLU slope
FUSED_SCALE = 2.0 ** 0.5  # FusedLeakyReLU output scale
IN_EPS = 1e-5             # nn.InstanceNorm2d default eps
PN_EPS = 1e-8             # PixelNorm eps


# ----------------------------- Pallas kernels -----------------------------

def make_conv_in_act_kernel(act_scale):
    """Fused: (patches @ W + conv_bias) -> InstanceNorm -> (+bias) LeakyReLU*scale.

    Block layout (one grid step == one image):
      p_ref : (1, HW, K)    im2col patches of this image
      w_ref : (K, Cout)     pre-scaled conv weight, (cin,kh,kw)-major rows
      b_ref : (1, Cout)     conv bias
      fb_ref: (1, Cout)     activation bias (zeros for the plain-LeakyReLU block)
      o_ref : (1, HW, Cout)
    """
    def kernel(p_ref, w_ref, b_ref, fb_ref, o_ref):
        p = p_ref[0]                                                # (HW, K)
        y = jnp.dot(p, w_ref[...],
                    preferred_element_type=jnp.float32) + b_ref[...]  # (HW, Cout)
        # InstanceNorm2d (no affine, biased variance) over the spatial axis.
        mean = jnp.mean(y, axis=0, keepdims=True)
        var = jnp.mean((y - mean) ** 2, axis=0, keepdims=True)
        xn = (y - mean) * jax.lax.rsqrt(var + IN_EPS)
        # LeakyReLU(0.2) (act_scale=1) or FusedLeakyReLU (bias, act_scale=sqrt(2)).
        z = xn + fb_ref[...]
        o_ref[0] = jnp.where(z >= 0, z, NEG_SLOPE * z) * act_scale
    return kernel


def latent_head_kernel(x_ref, w0_ref, b0_ref, w1_ref, b1_ref,
                       w2_ref, b2_ref, w3_ref, b3_ref, o_ref):
    """Fused latent head: avg-pool + flatten + PixelNorm + 4 EqualLinear layers.

    x_ref : (N, HW, C) final NHWC feature map (spatial flattened)
    w*_ref: (in_dim, out_dim) pre-scaled (weight*scale).T
    b*_ref: (1, out_dim)      bias * lr_mul
    """
    x = x_ref[...]
    pooled = jnp.mean(x, axis=1)                       # AdaptiveAvgPool2d((1,1))+Flatten
    ms = jnp.mean(pooled * pooled, axis=1, keepdims=True)
    h = pooled * jax.lax.rsqrt(ms + PN_EPS)            # PixelNorm
    layers = ((w0_ref, b0_ref, True), (w1_ref, b1_ref, True),
              (w2_ref, b2_ref, True), (w3_ref, b3_ref, False))
    for w_ref, b_ref, act in layers:
        h = jnp.dot(h, w_ref[...], preferred_element_type=jnp.float32) + b_ref[...]
        if act:                                        # fused_leaky_relu
            h = jnp.where(h >= 0, h, NEG_SLOPE * h) * FUSED_SCALE
    o_ref[...] = h


# ------------------------------ JAX glue code ------------------------------

def conv_block(x_nhwc, w_raw, conv_bias, stride, padding, fused_bias):
    """EqualConv2d + InstanceNorm2d + (Fused)LeakyReLU, fused in one pallas_call."""
    N, H, W, Cin = x_nhwc.shape
    Cout, _, KH, KW = w_raw.shape
    scale = 1.0 / math.sqrt(Cin * KH * KW)
    # (Cout,Cin,KH,KW) -> (Cin,KH,KW,Cout) -> (Cin*KH*KW, Cout): rows match the
    # (channel-major, then kh, kw) feature order of conv_general_dilated_patches.
    w_eff = jnp.transpose(w_raw * scale, (1, 2, 3, 0)).reshape(Cin * KH * KW, Cout)

    patches = jax.lax.conv_general_dilated_patches(
        x_nhwc, (KH, KW), (stride, stride),
        ((padding, padding), (padding, padding)),
        dimension_numbers=('NHWC', 'HWIO', 'NHWC'))          # (N, Ho, Wo, Cin*KH*KW)
    Ho = (H + 2 * padding - KH) // stride + 1
    Wo = (W + 2 * padding - KW) // stride + 1
    K = Cin * KH * KW
    HWo = Ho * Wo
    patches = patches.reshape(N, HWo, K)

    act_scale = 1.0 if fused_bias is None else FUSED_SCALE
    fb = (jnp.zeros((Cout,), jnp.float32) if fused_bias is None
          else fused_bias).reshape(1, Cout)

    out = pl.pallas_call(
        make_conv_in_act_kernel(act_scale),
        out_shape=jax.ShapeDtypeStruct((N, HWo, Cout), jnp.float32),
        grid=(N,),
        in_specs=[
            pl.BlockSpec((1, HWo, K), lambda n: (n, 0, 0)),
            pl.BlockSpec((K, Cout), lambda n: (0, 0)),
            pl.BlockSpec((1, Cout), lambda n: (0, 0)),
            pl.BlockSpec((1, Cout), lambda n: (0, 0)),
        ],
        out_specs=pl.BlockSpec((1, HWo, Cout), lambda n: (n, 0, 0)),
        compiler_params=pltpu.CompilerParams(dimension_semantics=("parallel",)),
    )(patches, w_eff, conv_bias.reshape(1, Cout), fb)
    return out.reshape(N, Ho, Wo, Cout)


def latent_head(x_nhwc, mlp_params):
    """toLatent: pool + flatten + PixelNorm + MLP(4 EqualLinear), one pallas_call."""
    N, H, W, C = x_nhwc.shape
    x = x_nhwc.reshape(N, H * W, C)
    args = [x]
    for lyr in mlp_params:
        out_dim, in_dim = lyr['w'].shape
        scale = 1.0 / math.sqrt(in_dim) * lyr['lr_mul']
        args.append(jnp.transpose(lyr['w'] * scale))          # (in_dim, out_dim)
        args.append((lyr['b'] * lyr['lr_mul']).reshape(1, out_dim))
    out_dim = mlp_params[-1]['w'].shape[0]
    return pl.pallas_call(
        latent_head_kernel,
        out_shape=jax.ShapeDtypeStruct((N, out_dim), jnp.float32),
    )(*args)


def init_encoder_params(key, in_channels=1, dim=8, n_downsample=3, max_dim=32):
    """Deterministic synthetic parameters matching the PyTorch __init__ shapes."""
    keys = jax.random.split(key, 64)
    ki = 0
    conv_blocks = []
    # block 0: EqualConv2d(in_channels, dim, 7, padding=3) + InstanceNorm + LeakyReLU
    conv_blocks.append(dict(
        w=jax.random.normal(keys[ki], (dim, in_channels, 7, 7), jnp.float32),
        b=jnp.zeros((dim,), jnp.float32),
        stride=1, padding=3, fused_bias=None))
    ki += 1
    dim_cur, dim_next = dim, dim * 2
    for _ in range(n_downsample):
        # EqualConv2d(dim_cur, dim_next, 4, stride=2, padding=1) + IN + FusedLeakyReLU
        conv_blocks.append(dict(
            w=jax.random.normal(keys[ki], (dim_next, dim_cur, 4, 4), jnp.float32),
            b=jnp.zeros((dim_next,), jnp.float32),
            stride=2, padding=1,
            fused_bias=jnp.zeros((dim_next,), jnp.float32)))
        ki += 1
        dim_cur = dim_next
        dim_next = min(max_dim, dim_next * 2)
    latent_dim = min(max_dim, dim_cur)

    # MLP(dim_cur, latent_dim, dim=latent_dim, n_layers=4, lr_mul=0.01)
    lr_mul = 0.01
    layer_specs = [
        (dim_cur, latent_dim, lr_mul, True),
        (latent_dim, latent_dim, lr_mul, True),
        (latent_dim, latent_dim, lr_mul, True),
        (latent_dim, latent_dim, 1.0, False),   # final EqualLinear (default lr_mul)
    ]
    mlp = []
    for (i_d, o_d, lm, act) in layer_specs:
        mlp.append(dict(
            w=jax.random.normal(keys[ki], (o_d, i_d), jnp.float32) / lm,  # torch init
            b=jnp.zeros((o_d,), jnp.float32),
            lr_mul=lm, activation=act))
        ki += 1
    return dict(conv_blocks=conv_blocks, mlp=mlp)


def encoder_forward(params, x_nchw):
    """Returns (todecode, latent) like Encoder.forward.  Input is NCHW float32."""
    x = jnp.transpose(x_nchw, (0, 2, 3, 1)).astype(jnp.float32)   # -> NHWC
    todecode = []
    for idx, blk in enumerate(params['conv_blocks']):
        x = conv_block(x, blk['w'], blk['b'], blk['stride'], blk['padding'],
                       blk['fused_bias'])
        if idx >= 3:
            todecode.append(jnp.transpose(x, (0, 3, 1, 2)))        # NCHW, like torch
    latent = latent_head(x, params['mlp'])
    return todecode, latent


if __name__ == "__main__":
    key = jax.random.PRNGKey(0)
    k_x, k_p = jax.random.split(key)
    # small config consistent with the module: in_channels=1, dim=8,
    # n_downsample=3, max_dim=32, spatial 16x16, batch 2
    x = jax.random.normal(k_x, (2, 1, 16, 16), jnp.float32)
    params = init_encoder_params(k_p, in_channels=1, dim=8,
                                 n_downsample=3, max_dim=32)
    todecode, latent = encoder_forward(params, x)
    jax.block_until_ready(latent)
    for t in todecode:
        jax.block_until_ready(t)
    assert latent.shape == (2, 32)
    assert todecode[0].shape == (2, 32, 2, 2)
    print("KERNEL_OK")
</pallas_src>

<mosaic_0001>
module attributes {stable_mosaic.version = 11 : i64} {
  func.func @kernel(%arg0: i32, %arg1: memref<1x256x49xf32, #tpu.memory_space<vmem>>, %arg2: memref<49x8xf32, #tpu.memory_space<vmem>>, %arg3: memref<1x8xf32, #tpu.memory_space<vmem>>, %arg4: memref<1x8xf32, #tpu.memory_space<vmem>>, %arg5: memref<1x256x8xf32, #tpu.memory_space<vmem>>) attributes {dimension_semantics = [#tpu.dimension_semantics<parallel>], iteration_bounds = array<i64: 2>, scalar_prefetch = 0 : i64, scratch_operands = 0 : i64, tpu.core_type = #tpu.core_type<tc>, window_params = [{transform_indices = @transform_0, window_bounds = array<i64: 1, 256, 49>}, {pipeline_mode = #tpu.pipeline_mode<synchronous>, transform_indices = @transform_1, window_bounds = array<i64: 49, 8>}, {pipeline_mode = #tpu.pipeline_mode<synchronous>, transform_indices = @transform_2, window_bounds = array<i64: 1, 8>}, {pipeline_mode = #tpu.pipeline_mode<synchronous>, transform_indices = @transform_3, window_bounds = array<i64: 1, 8>}, {transform_indices = @transform_4, window_bounds = array<i64: 1, 256, 8>}]} {
    %c0 = arith.constant 0 : index
    %c0_0 = arith.constant 0 : index
    %c0_1 = arith.constant 0 : index
    %0 = vector.load %arg1[%c0, %c0_0, %c0_1] : memref<1x256x49xf32, #tpu.memory_space<vmem>>, vector<1x256x49xf32>
    %1 = vector.shape_cast %0 : vector<1x256x49xf32> to vector<256x49xf32>
    %c0_2 = arith.constant 0 : index
    %c0_3 = arith.constant 0 : index
    %2 = vector.load %arg2[%c0_2, %c0_3] : memref<49x8xf32, #tpu.memory_space<vmem>>, vector<49x8xf32>
    %cst = arith.constant dense<0.000000e+00> : vector<256x8xf32>
    %3 = tpu.matmul %1, %2, %cst {dimension_numbers = #tpu.dot_dimension_numbers<[1], [0], [0], [1], [0, 0, 1, 1], [], []>} : vector<256x49xf32>, vector<49x8xf32>, vector<256x8xf32> -> vector<256x8xf32>
    %c0_4 = arith.constant 0 : index
    %c0_5 = arith.constant 0 : index
    %4 = vector.load %arg3[%c0_4, %c0_5] : memref<1x8xf32, #tpu.memory_space<vmem>>, vector<1x8xf32>
    %5 = vector.broadcast %4 : vector<1x8xf32> to vector<256x8xf32>
    %6 = arith.addf %3, %5 : vector<256x8xf32>
    %cst_6 = arith.constant dense<0.000000e+00> : vector<8xf32>
    %7 = vector.multi_reduction <add>, %6, %cst_6 [0] : vector<256x8xf32> to vector<8xf32>
    %8 = vector.shape_cast %7 : vector<8xf32> to vector<1x8xf32>
    %cst_7 = arith.constant 2.560000e+02 : f32
    %9 = vector.broadcast %cst_7 : f32 to vector<1x8xf32>
    %10 = arith.divf %8, %9 : vector<1x8xf32>
    %11 = vector.broadcast %10 : vector<1x8xf32> to vector<256x8xf32>
    %12 = arith.subf %6, %11 : vector<256x8xf32>
    %13 = arith.mulf %12, %12 : vector<256x8xf32>
    %cst_8 = arith.constant dense<0.000000e+00> : vector<8xf32>
    %14 = vector.multi_reduction <add>, %13, %cst_8 [0] : vector<256x8xf32> to vector<8xf32>
    %15 = vector.shape_cast %14 : vector<8xf32> to vector<1x8xf32>
    %cst_9 = arith.constant 2.560000e+02 : f32
    %16 = vector.broadcast %cst_9 : f32 to vector<1x8xf32>
    %17 = arith.divf %15, %16 : vector<1x8xf32>
    %18 = vector.broadcast %10 : vector<1x8xf32> to vector<256x8xf32>
    %19 = arith.subf %6, %18 : vector<256x8xf32>
    %cst_10 = arith.constant 9.99999974E-6 : f32
    %20 = vector.broadcast %cst_10 : f32 to vector<1x8xf32>
    %21 = arith.addf %17, %20 : vector<1x8xf32>
    %22 = math.rsqrt %21 : vector<1x8xf32>
    %23 = vector.broadcast %22 : vector<1x8xf32> to vector<256x8xf32>
    %24 = arith.mulf %19, %23 : vector<256x8xf32>
    %c0_11 = arith.constant 0 : index
    %c0_12 = arith.constant 0 : index
    %25 = vector.load %arg4[%c0_11, %c0_12] : memref<1x8xf32, #tpu.memory_space<vmem>>, vector<1x8xf32>
    %26 = vector.broadcast %25 : vector<1x8xf32> to vector<256x8xf32>
    %27 = arith.addf %24, %26 : vector<256x8xf32>
    %cst_13 = arith.constant 0.000000e+00 : f32
    %28 = vector.broadcast %cst_13 : f32 to vector<256x8xf32>
    %29 = arith.cmpf oge, %27, %28 : vector<256x8xf32>
    %cst_14 = arith.constant 2.000000e-01 : f32
    %30 = vector.broadcast %cst_14 : f32 to vector<256x8xf32>
    %31 = arith.mulf %30, %27 : vector<256x8xf32>
    %32 = arith.select %29, %27, %31 : vector<256x8xi1>, vector<256x8xf32>
    %cst_15 = arith.constant 1.000000e+00 : f32
    %33 = vector.broadcast %cst_15 : f32 to vector<256x8xf32>
    %34 = arith.mulf %32, %33 : vector<256x8xf32>
    %c0_16 = arith.constant 0 : index
    %c0_17 = arith.constant 0 : index
    %c0_18 = arith.constant 0 : index
    %35 = vector.load %arg5[%c0_16, %c0_17, %c0_18] : memref<1x256x8xf32, #tpu.memory_space<vmem>>, vector<1x256x8xf32>
    %36 = vector.shape_cast %35 : vector<1x256x8xf32> to vector<256x8xf32>
    %37 = vector.shape_cast %34 : vector<256x8xf32> to vector<1x256x8xf32>
    tpu.vector_store %arg5[%c0_16, %c0_17, %c0_18], %37 {strides = array<i32>} : memref<1x256x8xf32, #tpu.memory_space<vmem>>, vector<1x256x8xf32>,
    return
  }
  func.func @transform_0(%arg0: i32) -> (i32, i32, i32) {
    %c0_i32 = arith.constant 0 : i32
    %c0_i32_0 = arith.constant 0 : i32
    %c0_i32_1 = arith.constant 0 : i32
    return %arg0, %c0_i32, %c0_i32_0 : i32, i32, i32
  }
  func.func @transform_1(%arg0: i32) -> (i32, i32) {
    %c0_i32 = arith.constant 0 : i32
    %c0_i32_0 = arith.constant 0 : i32
    %c0_i32_1 = arith.constant 0 : i32
    return %c0_i32, %c0_i32_0 : i32, i32
  }
  func.func @transform_2(%arg0: i32) -> (i32, i32) {
    %c0_i32 = arith.constant 0 : i32
    %c0_i32_0 = arith.constant 0 : i32
    %c0_i32_1 = arith.constant 0 : i32
    return %c0_i32, %c0_i32_0 : i32, i32
  }
  func.func @transform_3(%arg0: i32) -> (i32, i32) {
    %c0_i32 = arith.constant 0 : i32
    %c0_i32_0 = arith.constant 0 : i32
    %c0_i32_1 = arith.constant 0 : i32
    return %c0_i32, %c0_i32_0 : i32, i32
  }
  func.func @transform_4(%arg0: i32) -> (i32, i32, i32) {
    %c0_i32 = arith.constant 0 : i32
    %c0_i32_0 = arith.constant 0 : i32
    %c0_i32_1 = arith.constant 0 : i32
    return %arg0, %c0_i32, %c0_i32_0 : i32, i32, i32
  }
}

</mosaic_0001>

<bundles_post_ra>
// kernel: tpu_custom_call.1
= control target key start
LH: loop header
LB: loop body
LE: loop exit
PB: predicated region body
PF: predicated region fallthrough
CT: control target
= control target key end

     0   :  { %s1244_s15 = smov 0   ;;  %s2053_s0 = inlined_call_operand.vmem [shape: f32[2,256,49], index: 0, kind: input, shape index: {}]   ;;  %s2054_s1 = inlined_call_operand.vmem [shape: f32[49,8], index: 1, kind: input, shape index: {}]   ;;  %s2055_s2 = inlined_call_operand.vmem [shape: f32[1,8], index: 2, kind: input, shape index: {}]   ;;  %s2056_s3 = inlined_call_operand.vmem [shape: f32[1,8], index: 3, kind: input, shape index: {}]   ;;  %s2057_s4 = inlined_call_operand.vmem [shape: f32[2,256,8], index: 4, kind: output, shape index: {}]  }
   0x1 LB: > { %s1032_s16 = sadd.s32 4294967295, %s1217_s15   ;;  %p1036_p0 = scmp.ge.s32.totalorder %s1217_s15, 1  ;;  %s1217_s15 = sphi %s1244_s15, %s14_s15  }
   0x2   : > { %p162_p1 = scmp.lt.s32.totalorder %s1217_s15, 3 }
   0x4   : > { %p163_p2 = pnand %p1036_p0, %p162_p1 }
   0x5   : > { %v230_v0 = vld [vmem:[%s2054_s1] sm:$0xff] (!%p163_p2)  ;;  %v231_v1 = vld [vmem:[%s2054_s1 + $0x8] sm:$0xff] (!%p163_p2)  ;;  %v232_v2 = vld [vmem:[%s2054_s1 + $0x10] sm:$0xff] (!%p163_p2)  ;;  %p188_p3 = scmp.lt.s32.totalorder (!%p163_p2), %s1032_s16, 1  ;;  %vm244_vm0 = vcmask (!%p163_p2), 400384   ;;  %vm341_vm1 = vcmask (!%p163_p2), 1040384  }
   0x6   : > { %166 = sbr.rel (%p163_p2) target bundleno = 458 (0x1ca), region = 36  ;;  %v1181_v3 = vpack.c.bf16 (!%p163_p2), %v231_v1, %v230_v0  ;;  %v233_v4 = vld [vmem:[%s2054_s1 + $0x18] sm:$0xff] (!%p163_p2)  ;;  %v234_v6 = vld [vmem:[%s2054_s1 + $0x20] sm:$0xff] (!%p163_p2)  ;;  %v235_v7 = vld [vmem:[%s2054_s1 + $0x28] sm:$0xff] (!%p163_p2)  ;;  %vm570_vm2 = vcmask (!%p163_p2), 64512  }
   0x7   : > { %v1185_v5 = vpack.c.bf16 (!%p163_p2), %v233_v4, %v232_v2  ;;  %v1189_v8 = vpack.c.bf16 (!%p163_p2), %v235_v7, %v234_v6  ;;  %v236_v10 = vld [vmem:[%s2054_s1 + $0x30] sm:$0x1] (!%p163_p2)  ;;  %v1350_v42 = vld [vmem:[%s2055_s2] ss:$0 sm:$0xff] (!%p163_p2) }
   0x8   : > { %1182 = vmatprep.subr.bf16.mxu0 (!%p163_p2), %v1181_v3  ;;  %1193 = vmatprep.subr.bf16.mxu1 (!%p163_p2), %v1181_v3 }
   0x9   : > { %1184 = vmatpush3.bf16.msra.mxu0 (!%p163_p2), %v1181_v3  ;;  %1197 = vmatpush3.bf16.msra.mxu1 (!%p163_p2), %v1181_v3 }
   0xa   : > { %1186 = vmatprep.subr.bf16.mxu0 (!%p163_p2), %v1185_v5  ;;  %1194 = vmatprep.subr.bf16.mxu1 (!%p163_p2), %v1185_v5 }
   0xd   : > { %s2074_s16 = smov (!%p188_p3, %s1032_s16), 1  ;;  %1188 = vmatpush3.bf16.msra.mxu0 %v1185_v5  ;;  %1198 = vmatpush3.bf16.msra.mxu1 %v1185_v5 }
   0xe   : > { %s1078_s29 = sshll.u32 %s2074_s16, 8  ;;  %1190 = vmatprep.subr.bf16.mxu0 %v1189_v8  ;;  %1195 = vmatprep.subr.bf16.mxu1 %v1189_v8 }
   0xf   : > { %s1278_s6 = scalar_lea.vmem %s2053_s0, %s1078_s29  ;;  %s1828_s17 = scalar_lea.vmem %s2057_s4, %s1078_s29 }
  0x10   : > { %v198_v9 = vld [vmem:[%s1278_s6] sm:$0xff]  ;;  %v199_v12 = vld [vmem:[%s1278_s6 + $0x8] sm:$0xff]  ;;  %v200_v14 = vld [vmem:[%s1278_s6 + $0x10] sm:$0xff] }
  0x11   : > { %1133 = vmatprep.mubr.msk.f32.mxu0 %vm244_vm0, %v198_v9  ;;  %v214_v11 = vld [vmem:[%s1278_s6 + $0x80] sm:$0xff]  ;;  %1192 = vmatpush3.bf16.msra.mxu0 %v1189_v8  ;;  %v215_v13 = vld [vmem:[%s1278_s6 + $0x88] sm:$0xff]  ;;  %v216_v15 = vld [vmem:[%s1278_s6 + $0x90] sm:$0xff] }
  0x12   : > { %1199 = vmatpush3.bf16.msra.mxu1 %v1189_v8  ;;  %1131 = vmatprep.subr.msk.mxu0 %vm341_vm1, %v236_v10  ;;  %v201_v16 = vld [vmem:[%s1278_s6 + $0x18] sm:$0xff]  ;;  %v202_v18 = vld [vmem:[%s1278_s6 + $0x20] sm:$0xff]  ;;  %v203_v20 = vld [vmem:[%s1278_s6 + $0x28] sm:$0xff] }
  0x13   : > { %1196 = vmatprep.subr.msk.mxu1 %vm341_vm1, %v236_v10  ;;  %1157 = vmatprep.mubr.msk.f32.mxu1 %vm244_vm0, %v214_v11  ;;  %v217_v17 = vld [vmem:[%s1278_s6 + $0x98] sm:$0xff]  ;;  %v218_v19 = vld [vmem:[%s1278_s6 + $0xa0] sm:$0xff]  ;;  %v219_v21 = vld [vmem:[%s1278_s6 + $0xa8] sm:$0xff] }
  0x14   : > { %v204_v22 = vld [vmem:[%s1278_s6 + $0x30] sm:$0xff]  ;;  %v205_v24 = vld [vmem:[%s1278_s6 + $0x38] sm:$0xff]  ;;  %v206_v26 = vld [vmem:[%s1278_s6 + $0x40] sm:$0xff] }
  0x15   : > { %1132 = vmatpush3.msk.msra.mxu0 %vm341_vm1, %v236_v10  ;;  %v220_v23 = vld [vmem:[%s1278_s6 + $0xb0] sm:$0xff]  ;;  %v221_v25 = vld [vmem:[%s1278_s6 + $0xb8] sm:$0xff]  ;;  %v222_v27 = vld [vmem:[%s1278_s6 + $0xc0] sm:$0xff] }
  0x16   : > { %1200 = vmatpush3.msk.msra.mxu1 %vm341_vm1, %v236_v10  ;;  %1134 = vmatmul.mubr.msk.f32.vlgmr.msra.gmra.mrb[0].mxu0 %vm244_vm0, %v199_v12  ;;  %v207_v28 = vld [vmem:[%s1278_s6 + $0x48] sm:$0xff]  ;;  %v208_v30 = vld [vmem:[%s1278_s6 + $0x50] sm:$0xff]  ;;  %v209_v32 = vld [vmem:[%s1278_s6 + $0x58] sm:$0xff] }
  0x17   : > { %1158 = vmatmul.mubr.msk.f32.vlgmr.msra.gmra.mrb[0].mxu1 %vm244_vm0, %v215_v13  ;;  %1136 = vmatprep.mubr.msk.f32.mxu0 %vm244_vm0, %v200_v14  ;;  %v223_v29 = vld [vmem:[%s1278_s6 + $0xc8] sm:$0xff]  ;;  %v224_v31 = vld [vmem:[%s1278_s6 + $0xd0] sm:$0xff]  ;;  %v225_v33 = vld [vmem:[%s1278_s6 + $0xd8] sm:$0xff] }
  0x18   : > { %1160 = vmatprep.mubr.msk.f32.mxu1 %vm244_vm0, %v216_v15  ;;  %v210_v34 = vld [vmem:[%s1278_s6 + $0x60] sm:$0xff]  ;;  %v211_v36 = vld [vmem:[%s1278_s6 + $0x68] sm:$0xff]  ;;  %v212_v38 = vld [vmem:[%s1278_s6 + $0x70] sm:$0xff] }
  0x19   : > { %v226_v35 = vld [vmem:[%s1278_s6 + $0xe0] sm:$0xff]  ;;  %v227_v37 = vld [vmem:[%s1278_s6 + $0xe8] sm:$0xff]  ;;  %v228_v39 = vld [vmem:[%s1278_s6 + $0xf0] sm:$0xff] }
  0x1a   : > { %1137 = vmatmul.mubr.msk.f32.gmra.mrb[2].mxu0 %vm244_vm0, %v201_v16  ;;  %v213_v40 = vld [vmem:[%s1278_s6 + $0x78] sm:$0xff] }
  0x1b   : > { %1161 = vmatmul.mubr.msk.f32.gmra.mrb[2].mxu1 %vm244_vm0, %v217_v17  ;;  %1139 = vmatprep.mubr.msk.f32.mxu0 %vm244_vm0, %v202_v18  ;;  %v229_v41 = vld [vmem:[%s1278_s6 + $0xf8] sm:$0xff] }
  0x1c   : > { %1163 = vmatprep.mubr.msk.f32.mxu1 %vm244_vm0, %v218_v19 }
  0x1e   : > { %1140 = vmatmul.mubr.msk.f32.gmra.mrb[4].mxu0 %vm244_vm0, %v203_v20 }
  0x1f   : > { %1164 = vmatmul.mubr.msk.f32.gmra.mrb[4].mxu1 %vm244_vm0, %v219_v21  ;;  %1142 = vmatprep.mubr.msk.f32.mxu0 %vm244_vm0, %v204_v22 }
  0x20   : > { %1166 = vmatprep.mubr.msk.f32.mxu1 %vm244_vm0, %v220_v23 }
  0x22   : > { %1143 = vmatmul.mubr.msk.f32.gmra.mrb[6].mxu0 %vm244_vm0, %v205_v24 }
  0x23   : > { %1167 = vmatmul.mubr.msk.f32.gmra.mrb[6].mxu1 %vm244_vm0, %v221_v25  ;;  %1145 = vmatprep.mubr.msk.f32.mxu0 %vm244_vm0, %v206_v26 }
  0x24   : > { %1169 = vmatprep.mubr.msk.f32.mxu1 %vm244_vm0, %v222_v27 }
  0x26   : > { %1146 = vmatmul.mubr.msk.f32.gmra.mrb[8].mxu0 %vm244_vm0, %v207_v28 }
  0x27   : > { %1170 = vmatmul.mubr.msk.f32.gmra.mrb[8].mxu1 %vm244_vm0, %v223_v29  ;;  %1148 = vmatprep.mubr.msk.f32.mxu0 %vm244_vm0, %v208_v30 }
  0x28   : > { %1172 = vmatprep.mubr.msk.f32.mxu1 %vm244_vm0, %v224_v31 }
  0x2a   : > { %1149 = vmatmul.mubr.msk.f32.gmra.mrb[10].mxu0 %vm244_vm0, %v209_v32 }
  0x2b   : > { %1173 = vmatmul.mubr.msk.f32.gmra.mrb[10].mxu1 %vm244_vm0, %v225_v33  ;;  %1151 = vmatprep.mubr.msk.f32.mxu0 %vm244_vm0, %v210_v34 }
  0x2c   : > { %1175 = vmatprep.mubr.msk.f32.mxu1 %vm244_vm0, %v226_v35 }
  0x2e   : > { %1152 = vmatmul.mubr.msk.f32.gmra.mrb[12].mxu0 %vm244_vm0, %v211_v36 }
  0x2f   : > { %1176 = vmatmul.mubr.msk.f32.gmra.mrb[12].mxu1 %vm244_vm0, %v227_v37  ;;  %1154 = vmatprep.mubr.msk.f32.mxu0 %vm244_vm0, %v212_v38 }
  0x30   : > { %1178 = vmatprep.mubr.msk.f32.mxu1 %vm244_vm0, %v228_v39 }
  0x32   : > { %1155 = vmatmul.mubr.msk.f32.gmra.mrb[14].mxu0 %vm244_vm0, %v213_v40 }
  0x33   : > { %1179 = vmatmul.mubr.msk.f32.gmra.mrb[14].mxu1 %vm244_vm0, %v229_v41 }
  0xe9   : > { %v1135_v43 = vpop.f32.mrb[0].mxu0 }
  0xea   : > { %v1352_v44 = vpop.f32.mrb[0].mxu1  ;;  %v1355_v45 = vadd.f32 %v1135_v43, %v1350_v42  ;;  %v411_v46 = vpop.f32.mrb[1].mxu0 }
  0xeb   : > { %v1357_v47 = vpop.f32.mrb[1].mxu1  ;;  %v1360_v48 = vadd.f32 %v1350_v42, %v411_v46 }
  0xec   : > { %v572_v49 = vsel %vm570_vm2, %v1355_v45, 0.0 }
  0xed   : > { %v571_v50 = vsel %vm570_vm2, %v1360_v48, 0.0  ;;  %v1138_v51 = vpop.f32.mrb[2].mxu0 }
  0xee   : > { %v1366_v52 = vpop.f32.mrb[2].mxu1  ;;  %v421_v53 = vpop.f32.mrb[3].mxu0  ;;  %v1371_v55 = vadd.f32 %v1138_v51, %v1350_v42  ;;  %v573_v57 = vadd.f32 %v572_v49, %v571_v50 }
  0xef   : > { %v1368_v54 = vpop.f32.mrb[3].mxu1  ;;  %v1374_v56 = vadd.f32 %v1350_v42, %v421_v53 }
  0xf0   : > { %v576_v0 = vsel %vm570_vm2, %v1371_v55, 0.0 }
  0xf1   : > { %v574_v58 = vsel %vm570_vm2, %v1374_v56, 0.0  ;;  %v1141_v59 = vpop.f32.mrb[4].mxu0 }
  0xf2   : > { %v1378_v60 = vpop.f32.mrb[4].mxu1  ;;  %v575_v61 = vadd.f32 %v574_v58, %v573_v57  ;;  %v431_v62 = vpop.f32.mrb[5].mxu0  ;;  %v1385_v1 = vadd.f32 %v1141_v59, %v1350_v42 }
  0xf3   : > { %v1380_v63 = vpop.f32.mrb[5].mxu1  ;;  %v1388_v2 = vadd.f32 %v1350_v42, %v431_v62 }
  0xf4   : > { %v577_v3 = vadd.f32 %v576_v0, %v575_v61  ;;  %v580_v10 = vsel %vm570_vm2, %v1385_v1, 0.0  ;;  %v1448_v0 = vadd.f32 %v1350_v42, %v1357_v47 }
  0xf5   : > { %v578_v4 = vsel %vm570_vm2, %v1388_v2, 0.0  ;;  %v1144_v5 = vpop.f32.mrb[6].mxu0 }
  0xf6   : > { %v1392_v6 = vpop.f32.mrb[6].mxu1  ;;  %v579_v7 = vadd.f32 %v578_v4, %v577_v3  ;;  %v441_v8 = vpop.f32.mrb[7].mxu0  ;;  %v1399_v11 = vadd.f32 %v1144_v5, %v1350_v42 }
  0xf7   : > { %v1394_v9 = vpop.f32.mrb[7].mxu1  ;;  %v1402_v12 = vadd.f32 %v1350_v42, %v441_v8  ;;  %v1456_v8 = vadd.f32 %v1352_v44, %v1350_v42 }
  0xf8   : > { %v581_v13 = vadd.f32 %v580_v10, %v579_v7  ;;  %v584_v20 = vsel %vm570_vm2, %v1399_v11, 0.0  ;;  %v602_v10 = vsel %vm570_vm2, %v1448_v0, 0.0 }
  0xf9   : > { %v582_v14 = vsel %vm570_vm2, %v1402_v12, 0.0  ;;  %v1147_v15 = vpop.f32.mrb[8].mxu0 }
  0xfa   : > { %v1406_v16 = vpop.f32.mrb[8].mxu1  ;;  %v583_v17 = vadd.f32 %v582_v14, %v581_v13  ;;  %v451_v18 = vpop.f32.mrb[9].mxu0  ;;  %v1411_v21 = vadd.f32 %v1147_v15, %v1350_v42  ;;  %v1462_v13 = vadd.f32 %v1350_v42, %v1368_v54  ;;  %v604_v15 = vsel %vm570_vm2, %v1456_v8, 0.0 }
  0xfb   : > { %v531_v19 = vpop.f32.mrb[9].mxu1  ;;  %v1414_v22 = vadd.f32 %v1350_v42, %v451_v18  ;;  %v1474_v18 = vadd.f32 %v1350_v42, %v1380_v63 }
  0xfc   : > { %v585_v23 = vadd.f32 %v584_v20, %v583_v17  ;;  %v588_v30 = vsel %vm570_vm2, %v1411_v21, 0.0  ;;  %v1468_v17 = vadd.f32 %v1366_v52, %v1350_v42  ;;  %v606_v44 = vsel %vm570_vm2, %v1462_v13, 0.0 }
  0xfd   : > { %v586_v24 = vsel %vm570_vm2, %v1414_v22, 0.0  ;;  %v1150_v25 = vpop.f32.mrb[10].mxu0  ;;  %v610_v52 = vsel %vm570_vm2, %v1474_v18, 0.0 }
  0xfe   : > { %v1174_v26 = vpop.f32.mrb[10].mxu1  ;;  %v587_v27 = vadd.f32 %v586_v24, %v585_v23  ;;  %v461_v28 = vpop.f32.mrb[11].mxu0  ;;  %v1421_v31 = vadd.f32 %v1150_v25, %v1350_v42  ;;  %v608_v54 = vsel %vm570_vm2, %v1468_v17, 0.0  ;;  %v1480_v24 = vadd.f32 %v1378_v60, %v1350_v42 }
  0xff   : > { %v541_v29 = vpop.f32.mrb[11].mxu1  ;;  %v1424_v32 = vadd.f32 %v1350_v42, %v461_v28  ;;  %v1486_v25 = vadd.f32 %v1350_v42, %v1394_v9 }
 0x100   : > { %v589_v33 = vadd.f32 %v588_v30, %v587_v27  ;;  %v592_v40 = vsel %vm570_vm2, %v1421_v31, 0.0  ;;  %v612_v63 = vsel %vm570_vm2, %v1480_v24, 0.0  ;;  %v1492_v30 = vadd.f32 %v1392_v6, %v1350_v42 }
 0x101   : > { %v590_v34 = vsel %vm570_vm2, %v1424_v32, 0.0  ;;  %v1153_v35 = vpop.f32.mrb[12].mxu0  ;;  %v614_v60 = vsel %vm570_vm2, %v1486_v25, 0.0  ;;  %v1508_v6 = vadd.f32 %v1350_v42, %v541_v29 }
 0x102   : > { %v1177_v36 = vpop.f32.mrb[12].mxu1  ;;  %v591_v37 = vadd.f32 %v590_v34, %v589_v33  ;;  %v471_v38 = vpop.f32.mrb[13].mxu0  ;;  %v1431_v41 = vadd.f32 %v1153_v35, %v1350_v42  ;;  %v1497_v33 = vadd.f32 %v1350_v42, %v531_v19  ;;  %v616_v9 = vsel %vm570_vm2, %v1492_v30, 0.0 }
 0x103   : > { %v551_v39 = vpop.f32.mrb[13].mxu1  ;;  %v1434_v43 = vadd.f32 %v1350_v42, %v471_v38  ;;  %v557_v29 = vadd.f32 %v1177_v36, %v1350_v42 }
 0x104   : > { %v593_v46 = vadd.f32 %v592_v40, %v591_v37  ;;  %v596_v59 = vsel %vm570_vm2, %v1431_v41, 0.0  ;;  %v1503_v37 = vadd.f32 %v1406_v16, %v1350_v42  ;;  %v618_v38 = vsel %vm570_vm2, %v1497_v33, 0.0 }
 0x105   : > { %v594_v49 = vsel %vm570_vm2, %v1434_v43, 0.0  ;;  %v1156_v50 = vpop.f32.mrb[14].mxu0  ;;  %v552_v16 = vadd.f32 %v1350_v42, %v551_v39 }
 0x106   : > { %v1180_v51 = vpop.f32.mrb[14].mxu1  ;;  %v595_v53 = vadd.f32 %v594_v49, %v593_v46  ;;  %v481_v57 = vpop.f32.mrb[15].mxu0  ;;  %v1441_v61 = vadd.f32 %v1156_v50, %v1350_v42  ;;  %v620_v19 = vsel %vm570_vm2, %v1503_v37, 0.0  ;;  %v1513_v49 = vadd.f32 %v1174_v26, %v1350_v42 }
 0x107   : > { %v561_v58 = vpop.f32.mrb[15].mxu1  ;;  %v1444_v62 = vadd.f32 %v1350_v42, %v481_v57  ;;  %v622_v50 = vsel %vm570_vm2, %v1508_v6, 0.0  ;;  %v628_v26 = vsel %vm570_vm2, %v557_v29, 0.0 }
 0x108   : > { %v597_v3 = vadd.f32 %v596_v59, %v595_v53  ;;  %v600_v7 = vsel %vm570_vm2, %v1441_v61, 0.0  ;;  %v624_v59 = vsel %vm570_vm2, %v1513_v49, 0.0 }
 0x109   : > { %v598_v4 = vsel %vm570_vm2, %v1444_v62, 0.0 }
 0x10a   : > { %v599_v5 = vadd.f32 %v598_v4, %v597_v3  ;;  %v626_v3 = vsel %vm570_vm2, %v552_v16, 0.0  ;;  %v562_v4 = vadd.f32 %v1350_v42, %v561_v58 }
 0x10c   : > { %v601_v47 = vadd.f32 %v600_v7, %v599_v5 }
 0x10e   : > { %v603_v14 = vadd.f32 %v602_v10, %v601_v47  ;;  %v567_v10 = vadd.f32 %v1180_v51, %v1350_v42  ;;  %v630_v47 = vsel %vm570_vm2, %v562_v4, 0.0 }
 0x110   : > { %v605_v20 = vadd.f32 %v604_v15, %v603_v14  ;;  %v632_v15 = vsel %vm570_vm2, %v567_v10, 0.0 }
 0x112   : > { %v607_v23 = vadd.f32 %v606_v44, %v605_v20 }
 0x114   : > { %v609_v27 = vadd.f32 %v608_v54, %v607_v23 }
 0x116   : > { %v611_v28 = vadd.f32 %v610_v52, %v609_v27 }
 0x118   : > { %v613_v34 = vadd.f32 %v612_v63, %v611_v28 }
 0x11a   : > { %v615_v35 = vadd.f32 %v614_v60, %v613_v34 }
 0x11c   : > { %v617_v40 = vadd.f32 %v616_v9, %v615_v35 }
 0x11e   : > { %v619_v46 = vadd.f32 %v618_v38, %v617_v40 }
 0x120   : > { %v621_v53 = vadd.f32 %v620_v19, %v619_v46 }
 0x122   : > { %v623_v57 = vadd.f32 %v622_v50, %v621_v53 }
 0x124   : > { %v625_v5 = vadd.f32 %v624_v59, %v623_v57 }
 0x126   : > { %v627_v7 = vadd.f32 %v626_v3, %v625_v5 }
 0x128   : > { %v629_v39 = vadd.f32 %v628_v26, %v627_v7 }
 0x12a   : > { %v631_v14 = vadd.f32 %v630_v47, %v629_v39 }
 0x12c   : > { %v633_v44 = vadd.f32 %v632_v15, %v631_v14 }
 0x12e   : > { %v634_v20 = vrot.slane %v633_v44, 4 }
 0x130   : > { %v635_v23 = vadd.f32 %v634_v20, %v633_v44 }
 0x132   : > { %v636_v36 = vrot.slane %v635_v23, 2 }
 0x134   : > { %v637_v54 = vadd.f32 %v636_v36, %v635_v23 }
 0x136   : > { %v638_v52 = vrot.slane %v637_v54, 1 }
 0x138   : > { %v639_v27 = vadd.f32 %v638_v52, %v637_v54 }
 0x13a   : > { %v1527_v58 = vmul.f32 0.00390625, %v639_v27 }
 0x13c   : > { %v1531_v28 = vsub.f32 %v1424_v32, %v1527_v58  ;;  %v1535_v42 = vsub.f32 %v1421_v31, %v1527_v58  ;;  %v1539_v51 = vsub.f32 %v1434_v43, %v1527_v58  ;;  %v1543_v63 = vsub.f32 %v1431_v41, %v1527_v58 }
 0x13d   : > { %v1547_v60 = vsub.f32 %v1444_v62, %v1527_v58  ;;  %v1551_v32 = vsub.f32 %v1441_v61, %v1527_v58  ;;  %v1554_v34 = vsub.f32 %v552_v16, %v1527_v58  ;;  %v1557_v31 = vsub.f32 %v557_v29, %v1527_v58 }
 0x13e   : > { %v1560_v43 = vsub.f32 %v562_v4, %v1527_v58  ;;  %v1563_v41 = vsub.f32 %v567_v10, %v1527_v58  ;;  %v1567_v62 = vsub.f32 %v1360_v48, %v1527_v58  ;;  %v1571_v61 = vsub.f32 %v1355_v45, %v1527_v58 }
 0x13f   : > { %v1575_v35 = vsub.f32 %v1374_v56, %v1527_v58  ;;  %v1579_v9 = vsub.f32 %v1371_v55, %v1527_v58  ;;  %v1587_v48 = vsub.f32 %v1388_v2, %v1527_v58  ;;  %v1593_v56 = vsub.f32 %v1385_v1, %v1527_v58 }
 0x140   : > { %v674_v38 = vmul.f32 %v1567_v62, %v1567_v62  ;;  %v675_v40 = vmul.f32 %v1571_v61, %v1571_v61  ;;  %v1601_v16 = vsub.f32 %v1402_v12, %v1527_v58  ;;  %v1608_v1 = vsub.f32 %v1399_v11, %v1527_v58 }
 0x141   : > { %v676_v45 = vmul.f32 %v1575_v35, %v1575_v35  ;;  %v677_v55 = vmul.f32 %v1579_v9, %v1579_v9  ;;  %v678_v2 = vmul.f32 %v1587_v48, %v1587_v48  ;;  %v679_v59 = vmul.f32 %v1593_v56, %v1593_v56 }
 0x142   : > { %v706_v46 = vsel %vm570_vm2, %v674_v38, 0.0  ;;  %v707_v19 = vsel %vm570_vm2, %v675_v40, 0.0  ;;  %v1615_v12 = vsub.f32 %v1414_v22, %v1527_v58  ;;  %v680_v4 = vmul.f32 %v1601_v16, %v1601_v16 }
 0x143   : > { %v708_v50 = vadd.f32 %v707_v19, %v706_v46  ;;  %v709_v53 = vsel %vm570_vm2, %v676_v45, 0.0  ;;  %v711_v29 = vsel %vm570_vm2, %v677_v55, 0.0  ;;  %v713_v5 = vsel %vm570_vm2, %v678_v2, 0.0 }
 0x144   : > { %v1622_v11 = vsub.f32 %v1411_v21, %v1527_v58  ;;  %v681_v26 = vmul.f32 %v1608_v1, %v1608_v1  ;;  %v715_v10 = vsel %vm570_vm2, %v679_v59, 0.0  ;;  %v682_v22 = vmul.f32 %v1615_v12, %v1615_v12 }
 0x145   : > { %v710_v57 = vadd.f32 %v709_v53, %v708_v50  ;;  %v717_v39 = vsel %vm570_vm2, %v680_v4, 0.0  ;;  %v684_v21 = vmul.f32 %v1531_v28, %v1531_v28  ;;  %v685_v54 = vmul.f32 %v1535_v42, %v1535_v42 }
 0x146   : > { %v683_v15 = vmul.f32 %v1622_v11, %v1622_v11  ;;  %v719_v44 = vsel %vm570_vm2, %v681_v26, 0.0  ;;  %v721_v23 = vsel %vm570_vm2, %v682_v22, 0.0  ;;  %v686_v38 = vmul.f32 %v1539_v51, %v1539_v51 }
 0x147   : > { %v712_v3 = vadd.f32 %v711_v29, %v710_v57  ;;  %v725_v40 = vsel %vm570_vm2, %v684_v21, 0.0  ;;  %v687_v55 = vmul.f32 %v1543_v63, %v1543_v63  ;;  %v727_v46 = vsel %vm570_vm2, %v685_v54, 0.0 }
 0x148   : > { %v723_v52 = vsel %vm570_vm2, %v683_v15, 0.0  ;;  %v1647_v50 = vsub.f32 %v1448_v0, %v1527_v58  ;;  %v688_v2 = vmul.f32 %v1547_v60, %v1547_v60  ;;  %v729_v53 = vsel %vm570_vm2, %v686_v38, 0.0 }
 0x149   : > { %v714_v7 = vadd.f32 %v713_v5, %v712_v3  ;;  %v1654_v59 = vsub.f32 %v1456_v8, %v1527_v58  ;;  %v689_v29 = vmul.f32 %v1551_v32, %v1551_v32  ;;  %v731_v3 = vsel %vm570_vm2, %v687_v55, 0.0 }
 0x14a   : > { %v1661_v0 = vsub.f32 %v1462_v13, %v1527_v58  ;;  %v690_v5 = vmul.f32 %v1647_v50, %v1647_v50  ;;  %v1668_v8 = vsub.f32 %v1468_v17, %v1527_v58  ;;  %v1675_v13 = vsub.f32 %v1474_v18, %v1527_v58 }
 0x14b   : > { %v716_v47 = vadd.f32 %v715_v10, %v714_v7  ;;  %v733_v7 = vsel %vm570_vm2, %v688_v2, 0.0  ;;  %v691_v10 = vmul.f32 %v1654_v59, %v1654_v59  ;;  %v663_v17 = vsub.f32 %v1480_v24, %v1527_v58 }
 0x14c   : > { %v694_v18 = vmul.f32 %v1675_v13, %v1675_v13 }
 0x14d   : > { %v718_v14 = vadd.f32 %v717_v39, %v716_v47  ;;  %v735_v47 = vsel %vm570_vm2, %v689_v29, 0.0  ;;  %v692_v39 = vmul.f32 %v1661_v0, %v1661_v0 }
 0x14e   : > { %v745_v55 = vsel %vm570_vm2, %v694_v18, 0.0 }
 0x14f   : > { %v720_v20 = vadd.f32 %v719_v44, %v718_v14  ;;  %v737_v14 = vsel %vm570_vm2, %v690_v5, 0.0  ;;  %v693_v44 = vmul.f32 %v1668_v8, %v1668_v8 }
 0x151   : > { %v722_v36 = vadd.f32 %v721_v23, %v720_v20  ;;  %v739_v20 = vsel %vm570_vm2, %v691_v10, 0.0  ;;  %v664_v23 = vsub.f32 %v1486_v25, %v1527_v58  ;;  %v743_v24 = vsel %vm570_vm2, %v693_v44, 0.0 }
 0x153   : > { %v724_v27 = vadd.f32 %v723_v52, %v722_v36  ;;  %v741_v36 = vsel %vm570_vm2, %v692_v39, 0.0  ;;  %v665_v52 = vsub.f32 %v1492_v30, %v1527_v58  ;;  %v668_v30 = vsub.f32 %v1508_v6, %v1527_v58 }
 0x154   : > { %v702_v6 = vmul.f32 %v1554_v34, %v1554_v34 }
 0x155   : > { %v726_v45 = vadd.f32 %v725_v40, %v724_v27  ;;  %v695_v27 = vmul.f32 %v663_v17, %v663_v17  ;;  %v666_v40 = vsub.f32 %v1497_v33, %v1527_v58  ;;  %v669_v33 = vsub.f32 %v1513_v49, %v1527_v58 }
 0x156   : > { %v703_v49 = vmul.f32 %v1557_v31, %v1557_v31 }
 0x157   : > { %v728_v19 = vadd.f32 %v727_v46, %v726_v45  ;;  %v696_v45 = vmul.f32 %v664_v23, %v664_v23  ;;  %v667_v46 = vsub.f32 %v1503_v37, %v1527_v58  ;;  %v747_v2 = vsel %vm570_vm2, %v695_v27, 0.0 }
 0x159   : > { %v730_v57 = vadd.f32 %v729_v53, %v728_v19  ;;  %v697_v19 = vmul.f32 %v665_v52, %v665_v52  ;;  %v749_v29 = vsel %vm570_vm2, %v696_v45, 0.0 }
 0x15b   : > { %v732_v4 = vadd.f32 %v731_v3, %v730_v57  ;;  %v698_v57 = vmul.f32 %v666_v40, %v666_v40  ;;  %v751_v5 = vsel %vm570_vm2, %v697_v19, 0.0 }
 0x15d   : > { %v734_v26 = vadd.f32 %v733_v7, %v732_v4  ;;  %v699_v4 = vmul.f32 %v667_v46, %v667_v46  ;;  %v753_v37 = vsel %vm570_vm2, %v698_v57, 0.0 }
 0x15f   : > { %v736_v22 = vadd.f32 %v735_v47, %v734_v26  ;;  %v700_v26 = vmul.f32 %v668_v30, %v668_v30  ;;  %v701_v47 = vmul.f32 %v669_v33, %v669_v33 }
 0x161   : > { %v738_v15 = vadd.f32 %v737_v14, %v736_v22  ;;  %v755_v22 = vsel %vm570_vm2, %v699_v4, 0.0  ;;  %v757_v14 = vsel %vm570_vm2, %v700_v26, 0.0  ;;  %v759_v58 = vsel %vm570_vm2, %v701_v47, 0.0 }
 0x163   : > { %v740_v21 = vadd.f32 %v739_v20, %v738_v15  ;;  %v704_v20 = vmul.f32 %v1560_v43, %v1560_v43 }
 0x165   : > { %v742_v54 = vadd.f32 %v741_v36, %v740_v21  ;;  %v761_v21 = vsel %vm570_vm2, %v702_v6, 0.0  ;;  %v705_v36 = vmul.f32 %v1563_v41, %v1563_v41 }
 0x167   : > { %v744_v38 = vadd.f32 %v743_v24, %v742_v54  ;;  %v763_v54 = vsel %vm570_vm2, %v703_v49, 0.0  ;;  %v765_v24 = vsel %vm570_vm2, %v704_v20, 0.0  ;;  %v767_v45 = vsel %vm570_vm2, %v705_v36, 0.0 }
 0x169   : > { %v746_v25 = vadd.f32 %v745_v55, %v744_v38 }
 0x16b   : > { %v748_v53 = vadd.f32 %v747_v2, %v746_v25 }
 0x16d   : > { %v750_v3 = vadd.f32 %v749_v29, %v748_v53 }
 0x16f   : > { %v752_v7 = vadd.f32 %v751_v5, %v750_v3 }
 0x171   : > { %v754_v10 = vadd.f32 %v753_v37, %v752_v7 }
 0x173   : > { %v756_v39 = vadd.f32 %v755_v22, %v754_v10 }
 0x175   : > { %v758_v15 = vadd.f32 %v757_v14, %v756_v39 }
 0x177   : > { %v760_v44 = vadd.f32 %v759_v58, %v758_v15 }
 0x179   : > { %v762_v18 = vadd.f32 %v761_v21, %v760_v44 }
 0x17b   : > { %v764_v27 = vadd.f32 %v763_v54, %v762_v18 }
 0x17d   : > { %v766_v38 = vadd.f32 %v765_v24, %v764_v27 }
 0x17f   : > { %v768_v55 = vadd.f32 %v767_v45, %v766_v38 }
 0x181   : > { %v769_v25 = vrot.slane %v768_v55, 4 }
 0x183   : > { %v770_v19 = vadd.f32 %v769_v25, %v768_v55 }
 0x185   : > { %v771_v2 = vrot.slane %v770_v19, 2 }
 0x187   : > { %v772_v53 = vadd.f32 %v771_v2, %v770_v19 }
 0x189   : > { %v773_v57 = vrot.slane %v772_v53, 1 }
 0x18b   : > { %v774_v29 = vadd.f32 %v773_v57, %v772_v53 }
 0x18d   : > { %v775_v3 = vmul.f32 0.00390625, %v774_v29 }
 0x18f   : > { %v776_v4 = vadd.f32 1e-05, %v775_v3 }
 0x191   : > { %1209 = vrsqrt.f32 %v776_v4 }
 0x19b   : > { %v1210_v5 = vpop.eup %1209 }
 0x19c   : > { %v799_v7 = vmul.f32 %v1210_v5, %v663_v17  ;;  %v800_v26 = vmul.f32 %v1210_v5, %v664_v23  ;;  %v801_v37 = vmul.f32 %v1210_v5, %v665_v52  ;;  %v802_v10 = vmul.f32 %v1210_v5, %v666_v40 }
 0x19d   : > { %v803_v47 = vmul.f32 %v1210_v5, %v667_v46  ;;  %v804_v22 = vmul.f32 %v1210_v5, %v668_v30  ;;  %v805_v39 = vmul.f32 %v1210_v5, %v669_v33  ;;  %v806_v6 = vmul.f32 %v1210_v5, %v1554_v34 }
 0x19e   : > { %v807_v14 = vmul.f32 %v1210_v5, %v1557_v31  ;;  %v1724_v15 = vmul.f32 %v1210_v5, %v1560_v43  ;;  %v1727_v49 = vmul.f32 %v1210_v5, %v1563_v41  ;;  %v778_v58 = vmul.f32 %v1210_v5, %v1567_v62 }
 0x19f   : > { %v779_v17 = vmul.f32 %v1210_v5, %v1571_v61  ;;  %v780_v23 = vmul.f32 %v1210_v5, %v1575_v35  ;;  %v781_v52 = vmul.f32 %v1210_v5, %v1579_v9  ;;  %v782_v40 = vmul.f32 %v1210_v5, %v1587_v48  ;;  %v1075_v9 = vld [vmem:[%s2056_s3] ss:$0 sm:$0xff] }
 0x1a0   : > { %v783_v34 = vmul.f32 %v1210_v5, %v1593_v56  ;;  %v784_v31 = vmul.f32 %v1210_v5, %v1601_v16  ;;  %v785_v43 = vmul.f32 %v1210_v5, %v1608_v1  ;;  %v786_v46 = vmul.f32 %v1210_v5, %v1615_v12 }
 0x1a1   : > { %v787_v41 = vmul.f32 %v1210_v5, %v1622_v11  ;;  %v788_v62 = vmul.f32 %v1210_v5, %v1531_v28  ;;  %v789_v61 = vmul.f32 %v1210_v5, %v1535_v42  ;;  %v790_v35 = vmul.f32 %v1210_v5, %v1539_v51 }
 0x1a2   : > { %v791_v48 = vmul.f32 %v1210_v5, %v1543_v63  ;;  %v792_v56 = vmul.f32 %v1210_v5, %v1547_v60  ;;  %v793_v16 = vmul.f32 %v1210_v5, %v1551_v32  ;;  %v794_v1 = vmul.f32 %v1210_v5, %v1647_v50 }
 0x1a3   : > { %v795_v12 = vmul.f32 %v1210_v5, %v1654_v59  ;;  %v796_v28 = vmul.f32 %v1210_v5, %v1661_v0  ;;  %v797_v42 = vmul.f32 %v1210_v5, %v1668_v8  ;;  %v798_v51 = vmul.f32 %v1210_v5, %v1675_v13 }
 0x1a4   : > { %v1753_v11 = vadd.f32 %v1075_v9, %v778_v58  ;;  %v1755_v30 = vadd.f32 %v1075_v9, %v779_v17  ;;  %v1757_v33 = vadd.f32 %v1075_v9, %v780_v23  ;;  %v1759_v63 = vadd.f32 %v1075_v9, %v781_v52 }
 0x1a5   : > { %v1761_v60 = vadd.f32 %v1075_v9, %v782_v40  ;;  %v1763_v32 = vadd.f32 %v1075_v9, %v783_v34  ;;  %v1765_v50 = vadd.f32 %v1075_v9, %v784_v31  ;;  %v1767_v59 = vadd.f32 %v1075_v9, %v785_v43 }
 0x1a6   : > { %v1769_v0 = vadd.f32 %v1075_v9, %v786_v46  ;;  %v1771_v8 = vadd.f32 %v1075_v9, %v787_v41  ;;  %v1773_v13 = vadd.f32 %v1075_v9, %v788_v62  ;;  %v1775_v44 = vadd.f32 %v1075_v9, %v789_v61 }
 0x1a7   : > { %v1777_v20 = vadd.f32 %v1075_v9, %v790_v35  ;;  %v1779_v21 = vadd.f32 %v1075_v9, %v791_v48  ;;  %v1781_v18 = vadd.f32 %v1075_v9, %v792_v56  ;;  %v1783_v36 = vadd.f32 %v1075_v9, %v793_v16 }
 0x1a8   : > { %v1785_v54 = vadd.f32 %v1075_v9, %v794_v1  ;;  %v1787_v27 = vadd.f32 %v1075_v9, %v795_v12  ;;  %v1789_v24 = vadd.f32 %v1075_v9, %v796_v28  ;;  %v1791_v38 = vadd.f32 %v1075_v9, %v797_v42 }
 0x1a9   : > { %v1793_v45 = vadd.f32 %v1075_v9, %v798_v51  ;;  %v1795_v55 = vadd.f32 %v1075_v9, %v799_v7  ;;  %v1797_v25 = vadd.f32 %v1075_v9, %v800_v26  ;;  %v1799_v19 = vadd.f32 %v1075_v9, %v801_v37 }
 0x1aa   : > { %v1801_v2 = vadd.f32 %v1075_v9, %v802_v10  ;;  %v1803_v53 = vadd.f32 %v1075_v9, %v803_v47  ;;  %v1805_v57 = vadd.f32 %v1075_v9, %v804_v22  ;;  %v1807_v29 = vadd.f32 %v1075_v9, %v805_v39 }
 0x1ab   : > { %v1809_v3 = vadd.f32 %v1075_v9, %v806_v6  ;;  %v1811_v4 = vadd.f32 %v1075_v9, %v807_v14  ;;  %vm849_vm3 = vcmp.ge.f32.partialorder %v1753_v11, 0.0  ;;  %vm850_vm4 = vcmp.ge.f32.partialorder %v1755_v30, 0.0 }
 0x1ac   : > { %vm851_vm5 = vcmp.ge.f32.partialorder %v1757_v33, 0.0  ;;  %vm852_vm6 = vcmp.ge.f32.partialorder %v1759_v63, 0.0  ;;  %vm853_vm7 = vcmp.ge.f32.partialorder %v1761_v60, 0.0  ;;  %vm854_vm8 = vcmp.ge.f32.partialorder %v1763_v32, 0.0 }
 0x1ad   : > { %vm855_vm9 = vcmp.ge.f32.partialorder %v1765_v50, 0.0  ;;  %vm856_vm10 = vcmp.ge.f32.partialorder %v1767_v59, 0.0  ;;  %v1831_v5 = vadd.f32 %v1075_v9, %v1724_v15  ;;  %v881_v7 = vmul.f32 0.2, %v1753_v11 }
 0x1ae   : > { %v882_v26 = vmul.f32 0.2, %v1755_v30  ;;  %v883_v37 = vmul.f32 0.2, %v1757_v33  ;;  %v1841_v10 = vadd.f32 %v1075_v9, %v1727_v49  ;;  %vm864_vm12 = vcmp.ge.f32.partialorder %v1783_v36, 0.0 }
 0x1af   : > { %vm865_vm13 = vcmp.ge.f32.partialorder %v1785_v54, 0.0  ;;  %v884_v47 = vmul.f32 0.2, %v1759_v63  ;;  %v885_v22 = vmul.f32 0.2, %v1761_v60  ;;  %vm870_vm1 = vcmp.ge.f32.partialorder %v1795_v55, 0.0 }
 0x1b0   : > { %v886_v39 = vmul.f32 0.2, %v1763_v32  ;;  %v887_v6 = vmul.f32 0.2, %v1765_v50  ;;  %v888_v14 = vmul.f32 0.2, %v1767_v59  ;;  %v913_v49 = vsel %vm849_vm3, %v1753_v11, %v881_v7 }
 0x1b1   : > { %v889_v15 = vmul.f32 0.2, %v1769_v0  ;;  %vm871_vm14 = vcmp.ge.f32.partialorder %v1797_v25, 0.0  ;;  %v890_v58 = vmul.f32 0.2, %v1771_v8  ;;  %v914_v52 = vsel %vm850_vm4, %v1755_v30, %v882_v26  ;;  %945 = vst.msk [vmem:[%s1828_s17] sm:$0xff] %vm570_vm2, %v913_v49 }
 0x1b2   : > { %v891_v17 = vmul.f32 0.2, %v1773_v13  ;;  %v892_v23 = vmul.f32 0.2, %v1775_v44  ;;  %vm875_vm3 = vcmp.ge.f32.partialorder %v1805_v57, 0.0  ;;  %vm876_vm0 = vcmp.ge.f32.partialorder %v1807_v29, 0.0 }
 0x1b3   : > { %vm878_vm11 = vcmp.ge.f32.partialorder %v1811_v4, 0.0  ;;  %v893_v40 = vmul.f32 0.2, %v1777_v20  ;;  %v894_v34 = vmul.f32 0.2, %v1779_v21  ;;  %v915_v43 = vsel %vm851_vm5, %v1757_v33, %v883_v37  ;;  %946 = vst.msk [vmem:[%s1828_s17 + $0x8] sm:$0xff] %vm570_vm2, %v914_v52 }
 0x1b4   : > { %v895_v31 = vmul.f32 0.2, %v1781_v18  ;;  %vm879_vm4 = vcmp.ge.f32.partialorder %v1831_v5, 0.0  ;;  %vm880_vm15 = vcmp.ge.f32.partialorder %v1841_v10, 0.0  ;;  %v896_v46 = vmul.f32 0.2, %v1783_v36 }
 0x1b5   : > { %v897_v41 = vmul.f32 0.2, %v1785_v54  ;;  %v898_v62 = vmul.f32 0.2, %v1787_v27  ;;  %v916_v61 = vsel %vm852_vm6, %v1759_v63, %v884_v47  ;;  %947 = vst.msk [vmem:[%s1828_s17 + $0x10] sm:$0xff] %vm570_vm2, %v915_v43  ;;  %v917_v56 = vsel %vm853_vm7, %v1761_v60, %v885_v22 }
 0x1b6   : > { %v899_v35 = vmul.f32 0.2, %v1789_v24  ;;  %v900_v9 = vmul.f32 0.2, %v1791_v38  ;;  %v901_v48 = vmul.f32 0.2, %v1793_v45  ;;  %v918_v28 = vsel %vm854_vm8, %v1763_v32, %v886_v39 }
 0x1b7   : > { %948 = vst.msk [vmem:[%s1828_s17 + $0x18] sm:$0xff] %vm570_vm2, %v916_v61  ;;  %v902_v16 = vmul.f32 0.2, %v1795_v55  ;;  %v903_v1 = vmul.f32 0.2, %v1797_v25  ;;  %949 = vst.msk [vmem:[%s1828_s17 + $0x20] sm:$0xff] %vm570_vm2, %v917_v56  ;;  %v919_v30 = vsel %vm855_vm9, %v1765_v50, %v887_v6  ;;  %v920_v32 = vsel %vm856_vm10, %v1767_v59, %v888_v14 }
 0x1b8   : > { %v904_v12 = vmul.f32 0.2, %v1799_v19  ;;  %v905_v42 = vmul.f32 0.2, %v1801_v2  ;;  %v906_v51 = vmul.f32 0.2, %v1803_v53 }
 0x1b9   : > { %v907_v11 = vmul.f32 0.2, %v1805_v57  ;;  %950 = vst.msk [vmem:[%s1828_s17 + $0x28] sm:$0xff] %vm570_vm2, %v918_v28  ;;  %v908_v33 = vmul.f32 0.2, %v1807_v29  ;;  %951 = vst.msk [vmem:[%s1828_s17 + $0x30] sm:$0xff] %vm570_vm2, %v919_v30 }
 0x1ba   : > { %v909_v63 = vmul.f32 0.2, %v1809_v3  ;;  %v910_v60 = vmul.f32 0.2, %v1811_v4  ;;  %v911_v7 = vmul.f32 0.2, %v1831_v5 }
 0x1bb   : > { %v912_v50 = vmul.f32 0.2, %v1841_v10  ;;  %vm2058_vm5 = vcmp.ge.f32.partialorder %v1769_v0, 0.0  ;;  %vm2059_vm6 = vcmp.ge.f32.partialorder %v1771_v8, 0.0  ;;  %952 = vst.msk [vmem:[%s1828_s17 + $0x38] sm:$0xff] %vm570_vm2, %v920_v32  ;;  %vm2060_vm7 = vcmp.ge.f32.partialorder %v1773_v13, 0.0 }
 0x1bc   : > { %v921_v26 = vsel %vm2058_vm5, %v1769_v0, %v889_v15  ;;  %v922_v37 = vsel %vm2059_vm6, %v1771_v8, %v890_v58  ;;  %v923_v59 = vsel %vm2060_vm7, %v1773_v13, %v891_v17  ;;  %vm2061_vm8 = vcmp.ge.f32.partialorder %v1775_v44, 0.0 }
 0x1bd   : > { %v924_v47 = vsel %vm2061_vm8, %v1775_v44, %v892_v23  ;;  %vm2062_vm9 = vcmp.ge.f32.partialorder %v1777_v20, 0.0  ;;  %vm2063_vm10 = vcmp.ge.f32.partialorder %v1779_v21, 0.0  ;;  %953 = vst.msk [vmem:[%s1828_s17 + $0x40] sm:$0xff] %vm570_vm2, %v921_v26  ;;  %954 = vst.msk [vmem:[%s1828_s17 + $0x48] sm:$0xff] %vm570_vm2, %v922_v37  ;;  %vm2064_vm5 = vcmp.ge.f32.partialorder %v1781_v18, 0.0 }
 0x1be   : > { %v925_v22 = vsel %vm2062_vm9, %v1777_v20, %v893_v40  ;;  %v926_v0 = vsel %vm2063_vm10, %v1779_v21, %v894_v34  ;;  %v927_v8 = vsel %vm2064_vm5, %v1781_v18, %v895_v31  ;;  %v928_v13 = vsel %vm864_vm12, %v1783_v36, %v896_v46  ;;  %955 = vst.msk [vmem:[%s1828_s17 + $0x50] sm:$0xff] %vm570_vm2, %v923_v59 }
 0x1bf   : > { %v929_v44 = vsel %vm865_vm13, %v1785_v54, %v897_v41  ;;  %vm2065_vm6 = vcmp.ge.f32.partialorder %v1787_v27, 0.0  ;;  %956 = vst.msk [vmem:[%s1828_s17 + $0x58] sm:$0xff] %vm570_vm2, %v924_v47  ;;  %957 = vst.msk [vmem:[%s1828_s17 + $0x60] sm:$0xff] %vm570_vm2, %v925_v22  ;;  %vm2066_vm12 = vcmp.ge.f32.partialorder %v1789_v24, 0.0  ;;  %vm2067_vm13 = vcmp.ge.f32.partialorder %v1791_v38, 0.0 }
 0x1c0   : > { %v930_v20 = vsel %vm2065_vm6, %v1787_v27, %v898_v62  ;;  %958 = vst.msk [vmem:[%s1828_s17 + $0x68] sm:$0xff] %vm570_vm2, %v926_v0  ;;  %v931_v21 = vsel %vm2066_vm12, %v1789_v24, %v899_v35  ;;  %v932_v18 = vsel %vm2067_vm13, %v1791_v38, %v900_v9  ;;  %vm2068_vm7 = vcmp.ge.f32.partialorder %v1793_v45, 0.0  ;;  %959 = vst.msk [vmem:[%s1828_s17 + $0x70] sm:$0xff] %vm570_vm2, %v927_v8 }
 0x1c1   : > { %v933_v36 = vsel %vm2068_vm7, %v1793_v45, %v901_v48  ;;  %v934_v54 = vsel %vm870_vm1, %v1795_v55, %v902_v16  ;;  %960 = vst.msk [vmem:[%s1828_s17 + $0x78] sm:$0xff] %vm570_vm2, %v928_v13  ;;  %961 = vst.msk [vmem:[%s1828_s17 + $0x80] sm:$0xff] %vm570_vm2, %v929_v44  ;;  %v935_v27 = vsel %vm871_vm14, %v1797_v25, %v903_v1  ;;  %vm2069_vm8 = vcmp.ge.f32.partialorder %v1799_v19, 0.0 }
 0x1c2   : > { %962 = vst.msk [vmem:[%s1828_s17 + $0x88] sm:$0xff] %vm570_vm2, %v930_v20  ;;  %v936_v24 = vsel %vm2069_vm8, %v1799_v19, %v904_v12  ;;  %vm2070_vm1 = vcmp.ge.f32.partialorder %v1801_v2, 0.0  ;;  %vm2071_vm9 = vcmp.ge.f32.partialorder %v1803_v53, 0.0  ;;  %963 = vst.msk [vmem:[%s1828_s17 + $0x90] sm:$0xff] %vm570_vm2, %v931_v21  ;;  %v939_v55 = vsel %vm875_vm3, %v1805_v57, %v907_v11 }
 0x1c3   : > { %v937_v38 = vsel %vm2070_vm1, %v1801_v2, %v905_v42  ;;  %v938_v45 = vsel %vm2071_vm9, %v1803_v53, %v906_v51  ;;  %964 = vst.msk [vmem:[%s1828_s17 + $0x98] sm:$0xff] %vm570_vm2, %v932_v18  ;;  %965 = vst.msk [vmem:[%s1828_s17 + $0xa0] sm:$0xff] %vm570_vm2, %v933_v36  ;;  %v940_v25 = vsel %vm876_vm0, %v1807_v29, %v908_v33  ;;  %vm2072_vm14 = vcmp.ge.f32.partialorder %v1809_v3, 0.0 }
 0x1c4   : > { %966 = vst.msk [vmem:[%s1828_s17 + $0xa8] sm:$0xff] %vm570_vm2, %v934_v54  ;;  %v941_v19 = vsel %vm2072_vm14, %v1809_v3, %v909_v63  ;;  %v942_v2 = vsel %vm878_vm11, %v1811_v4, %v910_v60  ;;  %967 = vst.msk [vmem:[%s1828_s17 + $0xb0] sm:$0xff] %vm570_vm2, %v935_v27  ;;  %v943_v53 = vsel %vm879_vm4, %v1831_v5, %v911_v7 }
 0x1c5   : > { %968 = vst.msk [vmem:[%s1828_s17 + $0xb8] sm:$0xff] %vm570_vm2, %v936_v24  ;;  %969 = vst.msk [vmem:[%s1828_s17 + $0xc0] sm:$0xff] %vm570_vm2, %v937_v38  ;;  %v944_v57 = vsel %vm880_vm15, %v1841_v10, %v912_v50 }
 0x1c6   : > { %970 = vst.msk [vmem:[%s1828_s17 + $0xc8] sm:$0xff] %vm570_vm2, %v938_v45  ;;  %971 = vst.msk [vmem:[%s1828_s17 + $0xd0] sm:$0xff] %vm570_vm2, %v939_v55 }
 0x1c7   : > { %972 = vst.msk [vmem:[%s1828_s17 + $0xd8] sm:$0xff] %vm570_vm2, %v940_v25  ;;  %973 = vst.msk [vmem:[%s1828_s17 + $0xe0] sm:$0xff] %vm570_vm2, %v941_v19 }
 0x1c8   : > { %974 = vst.msk [vmem:[%s1828_s17 + $0xe8] sm:$0xff] %vm570_vm2, %v942_v2  ;;  %975 = vst.msk [vmem:[%s1828_s17 + $0xf0] sm:$0xff] %vm570_vm2, %v943_v53 }
 0x1c9   : > { %976 = vst.msk [vmem:[%s1828_s17 + $0xf8] sm:$0xff] %vm570_vm2, %v944_v57 }
 0x1ca PF: > { %s14_s15 = sadd.s32 1, %s1217_s15  }
 0x1cb   : > { %p11_p4 = scmp.ge.s32.totalorder %s14_s15, 4  }
 0x1cd   :  { %13 = sbr.rel (!%p11_p4) target bundleno = 1 (0x1), region = 66 }

</bundles_post_ra>
